<compile_context>
chip_gen: v7x
topology: tpu7x:2x2x1
jax: 0.10.0
libtpu: 0.0.40
codegen_flags: <defaults>
</compile_context>

<pallas_src>
import functools

import jax
import jax.numpy as jnp
from jax import lax
from jax.experimental import pallas as pl
from jax.experimental.pallas import tpu as pltpu


def _round_up(x, m):
    return ((x + m - 1) // m) * m


def _inner_product_decoder_kernel(a_ref, b_ref, o_ref):
    """One (tm, tn) tile of sigmoid(z @ z.T).

    a_ref: (tm, D) row tile of z
    b_ref: (tn, D) row tile of z (contracted on D -> column tile of z.T)
    o_ref: (tm, tn) output tile
    """
    logits = lax.dot_general(
        a_ref[...],
        b_ref[...],
        dimension_numbers=(((1,), (1,)), ((), ())),
        preferred_element_type=jnp.float32,
    )
    # sigmoid(x) = 0.5 * tanh(0.5 * x) + 0.5 : one EUP op (tanh); the mul/adds
    # ride the VALU, which has slack in this writeback-bound kernel.
    o_ref[...] = (0.5 * jnp.tanh(0.5 * logits) + 0.5).astype(o_ref.dtype)


def _vmem_budget_bytes():
    """Generation-aware VMEM budget for tile selection (v7x: 64 MiB physical)."""
    try:
        cap = pltpu.get_tpu_info().vmem_capacity_bytes
    except Exception:
        cap = 64 * 1024 * 1024  # be conservative (v7x-sized) if query fails
    # Leave headroom for compiler scratch; never ask for more than 96 MiB.
    return int(min(cap * 0.6, 96 * 1024 * 1024))


def _choose_tiles(N, D, in_bytes, out_bytes, budget):
    """Return (tm, tn, rhs_resident)."""
    z_bytes = N * D * in_bytes
    # Small z: keep the whole rhs VMEM-resident (DMA'd once via a constant
    # block index) and tile only rows; aim for ~4 row blocks (never 1 when
    # N > tile) so v7x uses both TensorCores and writeback pipelines.
    if N <= 2048 and z_bytes <= 8 * 1024 * 1024:
        if N >= 512:
            tm = _round_up(pl.cdiv(N, 4), 128)
        else:
            tm = max(8, _round_up(pl.cdiv(N, 4), 8))
        tm = min(tm, N)
        return tm, N, True
    # Large z: 2-D grid, biggest double-buffered tiles that fit the budget.
    for tm, tn in ((1024, 1024), (1024, 512), (512, 512), (512, 256), (256, 256)):
        foot = 2 * (tm + tn) * D * in_bytes + 2 * tm * tn * out_bytes
        if foot <= budget:
            return tm, tn, False
    return 256, 128, False


@functools.partial(jax.jit, static_argnames=("out_dtype",))
def _decode_kernel_call(z, *, out_dtype):
    N, D = z.shape
    in_bytes = jnp.dtype(z.dtype).itemsize
    out_bytes = jnp.dtype(out_dtype).itemsize

    budget = _vmem_budget_bytes()
    tm, tn, rhs_resident = _choose_tiles(N, D, in_bytes, out_bytes, budget)

    if rhs_resident:
        grid = (pl.cdiv(N, tm),)
        in_specs = [
            pl.BlockSpec((tm, D), lambda i: (i, 0)),
            pl.BlockSpec((N, D), lambda i: (0, 0)),  # constant index: DMA'd once
        ]
        out_specs = pl.BlockSpec((tm, N), lambda i: (i, 0))
        semantics = ("parallel",)
        rhs_read_passes = 1
        eff_tn = N
    else:
        grid = (pl.cdiv(N, tm), pl.cdiv(N, tn))
        in_specs = [
            pl.BlockSpec((tm, D), lambda i, j: (i, 0)),
            pl.BlockSpec((tn, D), lambda i, j: (j, 0)),
        ]
        out_specs = pl.BlockSpec((tm, tn), lambda i, j: (i, j))
        semantics = ("parallel", "parallel")
        rhs_read_passes = pl.cdiv(N, tm)
        eff_tn = tn

    # Double-buffered lhs + rhs tiles + output tile.
    footprint = (2 * (tm + eff_tn) * D * in_bytes
                 + 2 * tm * eff_tn * out_bytes)
    vmem_limit = int(min(max(2 * footprint, 32 * 1024 * 1024), budget))

    cost = pl.CostEstimate(
        flops=2 * N * N * D,
        transcendentals=N * N,
        bytes_accessed=(1 + rhs_read_passes) * N * D * in_bytes
        + N * N * out_bytes,
    )

    return pl.pallas_call(
        _inner_product_decoder_kernel,
        out_shape=jax.ShapeDtypeStruct((N, N), out_dtype),
        grid=grid,
        in_specs=in_specs,
        out_specs=out_specs,
        compiler_params=pltpu.CompilerParams(
            dimension_semantics=semantics,
            vmem_limit_bytes=vmem_limit,
        ),
        cost_estimate=cost,
    )(z, z)


def inner_product_decoder(z, *, dropout=0.0, training=False, rng=None,
                          cast_to_bf16=False, out_dtype=None):
    """JAX/Pallas equivalent of InnerProductDecoder.forward (act=sigmoid).

    Perf note: pass out_dtype=jnp.bfloat16 (and cast_to_bf16=True) for large
    graphs — the kernel is bound by the N^2 adjacency writeback and bf16
    halves those HBM bytes.
    """
    # Capture the caller's intended output dtype *before* any bf16 input cast.
    if out_dtype is None:
        out_dtype = z.dtype
    if training and dropout > 0.0:
        # F.dropout: zero with prob p, scale survivors by 1/(1-p).
        # Elementwise, stochastic -> plain-JAX glue in front of the kernel.
        keep = jax.random.bernoulli(rng, 1.0 - dropout, z.shape)
        z = jnp.where(keep, z / (1.0 - dropout), 0.0).astype(z.dtype)
    if cast_to_bf16:
        # bf16 MXU inputs (halves input DMA bytes); accumulation stays f32.
        z = z.astype(jnp.bfloat16)
    return _decode_kernel_call(z, out_dtype=jnp.dtype(out_dtype))


if __name__ == "__main__":
    key = jax.random.PRNGKey(0)
    k_z, k_drop = jax.random.split(key)

    # Small graph-autoencoder latent: N=256 nodes, D=32 latent dims.
    N, D = 256, 32
    z = jax.random.normal(k_z, (N, D), dtype=jnp.float32)

    # Eval-mode forward (dropout inactive), matching the torch module in .eval().
    adj = jax.block_until_ready(
        inner_product_decoder(z, dropout=0.5, training=False, rng=k_drop))
    ref = jax.nn.sigmoid(z @ z.T)
    assert adj.shape == (N, N) and adj.dtype == z.dtype
    assert jnp.allclose(adj, ref, atol=1e-5, rtol=1e-5), float(
        jnp.max(jnp.abs(adj - ref)))

    # Non-tile-aligned N exercises the cdiv / ragged-edge path (no pad, no slice).
    N2 = 200
    z2 = jax.random.normal(k_z, (N2, D), dtype=jnp.float32)
    adj2 = jax.block_until_ready(inner_product_decoder(z2))
    ref2 = jax.nn.sigmoid(z2 @ z2.T)
    assert adj2.shape == (N2, N2)
    assert jnp.allclose(adj2, ref2, atol=1e-5, rtol=1e-5)

    # Training-mode path (stochastic dropout outside the kernel; just runs).
    adj_train = jax.block_until_ready(
        inner_product_decoder(z, dropout=0.5, training=True, rng=k_drop))
    assert adj_train.shape == (N, N)

    # Recommended writeback-saving config: bf16 output (+ bf16 MXU inputs).
    adj_bf16 = jax.block_until_ready(
        inner_product_decoder(z, cast_to_bf16=True, out_dtype=jnp.bfloat16))
    assert adj_bf16.dtype == jnp.bfloat16
    assert jnp.allclose(adj_bf16.astype(jnp.float32), ref, atol=2e-2, rtol=2e-2)

    print("KERNEL_OK")
</pallas_src>

<mosaic_0001>
module attributes {stable_mosaic.version = 11 : i64} {
  func.func @_inner_product_decoder_kernel(%arg0: i32, %arg1: memref<64x32xf32, #tpu.memory_space<vmem>>, %arg2: memref<256x32xf32, #tpu.memory_space<vmem>>, %arg3: memref<64x256xf32, #tpu.memory_space<vmem>>) attributes {dimension_semantics = [#tpu.dimension_semantics<parallel>], iteration_bounds = array<i64: 4>, scalar_prefetch = 0 : i64, scratch_operands = 0 : i64, tpu.core_type = #tpu.core_type<tc>, window_params = [{transform_indices = @transform_0, window_bounds = array<i64: 64, 32>}, {pipeline_mode = #tpu.pipeline_mode<synchronous>, transform_indices = @transform_1, window_bounds = array<i64: 256, 32>}, {transform_indices = @transform_2, window_bounds = array<i64: 64, 256>}]} {
    %c0 = arith.constant 0 : index
    %c0_0 = arith.constant 0 : index
    %0 = vector.load %arg1[%c0, %c0_0] : memref<64x32xf32, #tpu.memory_space<vmem>>, vector<64x32xf32>
    %c0_1 = arith.constant 0 : index
    %c0_2 = arith.constant 0 : index
    %1 = vector.load %arg2[%c0_1, %c0_2] : memref<256x32xf32, #tpu.memory_space<vmem>>, vector<256x32xf32>
    %cst = arith.constant dense<0.000000e+00> : vector<64x256xf32>
    %2 = tpu.matmul %0, %1, %cst {dimension_numbers = #tpu.dot_dimension_numbers<[1], [1], [0], [0], [0, 0, 1, 0], [], []>} : vector<64x32xf32>, vector<256x32xf32>, vector<64x256xf32> -> vector<64x256xf32>
    %cst_3 = arith.constant 5.000000e-01 : f32
    %3 = vector.broadcast %cst_3 : f32 to vector<64x256xf32>
    %4 = arith.mulf %3, %2 : vector<64x256xf32>
    %5 = math.tanh %4 : vector<64x256xf32>
    %cst_4 = arith.constant 5.000000e-01 : f32
    %6 = vector.broadcast %cst_4 : f32 to vector<64x256xf32>
    %7 = arith.mulf %6, %5 : vector<64x256xf32>
    %cst_5 = arith.constant 5.000000e-01 : f32
    %8 = vector.broadcast %cst_5 : f32 to vector<64x256xf32>
    %9 = arith.addf %7, %8 : vector<64x256xf32>
    %c0_6 = arith.constant 0 : index
    %c0_7 = arith.constant 0 : index
    %10 = vector.load %arg3[%c0_6, %c0_7] : memref<64x256xf32, #tpu.memory_space<vmem>>, vector<64x256xf32>
    tpu.vector_store %arg3[%c0_6, %c0_7], %9 {strides = array<i32>} : memref<64x256xf32, #tpu.memory_space<vmem>>, vector<64x256xf32>,
    return
  }
  func.func @transform_0(%arg0: i32) -> (i32, i32) {
    %c0_i32 = arith.constant 0 : i32
    %c0_i32_0 = arith.constant 0 : i32
    return %arg0, %c0_i32 : i32, i32
  }
  func.func @transform_1(%arg0: i32) -> (i32, i32) {
    %c0_i32 = arith.constant 0 : i32
    %c0_i32_0 = arith.constant 0 : i32
    %c0_i32_1 = arith.constant 0 : i32
    return %c0_i32, %c0_i32_0 : i32, i32
  }
  func.func @transform_2(%arg0: i32) -> (i32, i32) {
    %c0_i32 = arith.constant 0 : i32
    %c0_i32_0 = arith.constant 0 : i32
    return %arg0, %c0_i32 : i32, i32
  }
}

</mosaic_0001>

<bundles_post_ra>
// kernel: _decode_kernel_call.1
= control target key start
LH: loop header
LB: loop body
LE: loop exit
PB: predicated region body
PF: predicated region fallthrough
CT: control target
= control target key end

     0   :  { %7 = vsyncpa [#allocation3], 0  ;;  %s1223_s0 = inlined_call_operand.vmem [shape: f32[256,32], index: 0, kind: input, shape index: {}, may-alias: {0,1}]   ;;  %s1224_s1 = inlined_call_operand.vmem [shape: f32[256,32], index: 1, kind: input, shape index: {}, may-alias: {0,1}]   ;;  %s1225_s2 = inlined_call_operand.hbm [shape: f32[256,256], index: 2, kind: output, shape index: {}]  }
   0x1   :  { %9 = vsyncpa [#allocation3 + $0x1], 0  ;;  %s898_s9 = smov 0   ;;  %s900_s10 = smov 0  }
   0x2   :  { %s902_s11 = smov 0   ;;  %s904_s12 = smov 0  }
   0x3 LB: > { %s919_s13 = sadd.s32 4294967295, %s878_s12   ;;  %s576_s14 = sadd.s32 4294967294, %s878_s12   ;;  %s878_s12 = sphi %s904_s12, %s1233_s12   ;;  %s874_s11 = sphi %s902_s11, %s1232_s11   ;;  %s870_s10 = sphi %s900_s10, %s1231_s10   ;;  %s866_s9 = sphi %s898_s9, %s1230_s9  }
   0x4   : > { %s923_s15 = sadd.s32 1, %s878_s12   ;;  %s69_s16 = sadd.s32 1, %s874_s11 }
   0x5   : > { %s66_s17 = ssub.s32 %s878_s12, %s923_s15  ;;  %p79_p0 = scmp.ne.s32.totalorder %s874_s11, %s870_s10 }
   0x6   : > { %p67_p1 = scmp.eq.s32.totalorder %s66_s17, 0  ;;  %p80_p2 = scmp.eq.s32.totalorder %s919_s13, 3 }
   0x7   : > { %p85_p3 = scmp.ne.s32.totalorder %s870_s10, %s866_s9  ;;  %p86_p4 = scmp.eq.s32.totalorder %s576_s14, 3 }
   0x8   : > { %s934_s18 = scalar_select %p67_p1, %s874_s11, %s69_s16  }
   0x9   : > { %p936_p5 = por %p80_p2, %p79_p0  ;;  %p940_p6 = por %p86_p4, %p85_p3 }
   0xa   : > { %p579_p7 = scmp.ge.s32.totalorder %s878_s12, 1  ;;  %p116_p8 = scmp.lt.s32.totalorder %s878_s12, 5 }
   0xc   : > { %p117_p9 = pnand %p579_p7, %p116_p8 }
   0xd   : > { %v169_v0 = vld [vmem:[%s1224_s1 + $0x80] sm:$0xff] (!%p117_p9)  ;;  %v170_v1 = vld [vmem:[%s1224_s1 + $0x88] sm:$0xff] (!%p117_p9)  ;;  %vm185_vm0 = vcmask (!%p117_p9), 261120   ;;  %s581_s27 = sshll.u32 (!%p117_p9), %s919_s13, 3  ;;  %v171_v6 = vld [vmem:[%s1224_s1 + $0x90] sm:$0xff] (!%p117_p9)  ;;  %s630_s14 = sshll.u32 (!%p117_p9), %s919_s13, 11 }
   0xe   : > { %120 = sbr.rel (%p117_p9) target bundleno = 339 (0x153), region = 28  ;;  %v153_v2 = vld [vmem:[%s1224_s1] sm:$0xff] (!%p117_p9)  ;;  %v679_v3 = vpack.c.bf16 (!%p117_p9), %v170_v1, %v169_v0  ;;  %vm958_vm1 = vmpackc.low (!%p117_p9), %vm185_vm0, %vm185_vm0  ;;  %v154_v5 = vld [vmem:[%s1224_s1 + $0x8] sm:$0xff] (!%p117_p9)  ;;  %p139_p10 = scmp.lt.s32.totalorder (!%p117_p9), %s581_s27, 31 }
   0xf   : > { %v682_v7 = vpack.c.bf16 (!%p117_p9), %v154_v5, %v153_v2  ;;  %v172_v8 = vld [vmem:[%s1224_s1 + $0x98] sm:$0xff] (!%p117_p9)  ;;  %v155_v10 = vld [vmem:[%s1224_s1 + $0x10] sm:$0xff] (!%p117_p9)  ;;  %v173_v12 = vld [vmem:[%s1224_s1 + $0xa0] sm:$0xff] (!%p117_p9)  ;;  %s1173_s22 = scalar_lea.hbm (!%p117_p9), %s1225_s2, %s630_s14  ;;  %s880_s24 = smov (!%p117_p9), [#allocation2]  }
  0x10   : > { %681 = vmatprep.subr.msk.bf16.mxu0 (!%p117_p9), %vm958_vm1, %v679_v3  ;;  %727 = vmatprep.subr.msk.bf16.mxu1 (!%p117_p9), %vm958_vm1, %v679_v3  ;;  %v685_v9 = vpack.c.bf16 (!%p117_p9), %v172_v8, %v171_v6  ;;  %v156_v11 = vld [vmem:[%s1224_s1 + $0x18] sm:$0xff] (!%p117_p9)  ;;  %v174_v13 = vld [vmem:[%s1224_s1 + $0xa8] sm:$0xff] (!%p117_p9)  ;;  %v157_v18 = vld [vmem:[%s1224_s1 + $0x20] sm:$0xff] (!%p117_p9)  ;;  %s820_s25 = sshll.u32 (!%p117_p9), %s880_s24, 4  ;;  %s821_s25 = int_to_ptr.vmem [resolvable:$false] %s820_s25 }
  0x11   : > { %684 = vmatpush3.bf16.xpose.msk.msra.mxu0 (!%p117_p9), %vm958_vm1, %v682_v7  ;;  %735 = vmatpush3.bf16.xpose.msk.msra.mxu1 (!%p117_p9), %vm958_vm1, %v682_v7  ;;  %v688_v14 = vpack.c.bf16 (!%p117_p9), %v156_v11, %v155_v10  ;;  %v691_v15 = vpack.c.bf16 (!%p117_p9), %v174_v13, %v173_v12  ;;  %v158_v19 = vld [vmem:[%s1224_s1 + $0x28] sm:$0xff] (!%p117_p9)  ;;  %v175_v20 = vld [vmem:[%s1224_s1 + $0xb0] sm:$0xff] (!%p117_p9)  ;;  %v176_v21 = vld [vmem:[%s1224_s1 + $0xb8] sm:$0xff] (!%p117_p9) }
  0x12   : > { %687 = vmatprep.subr.msk.bf16.mxu0 (!%p117_p9), %vm958_vm1, %v685_v9  ;;  %728 = vmatprep.subr.msk.bf16.mxu1 (!%p117_p9), %vm958_vm1, %v685_v9  ;;  %v694_v22 = vpack.c.bf16 (!%p117_p9), %v158_v19, %v157_v18  ;;  %v697_v23 = vpack.c.bf16 (!%p117_p9), %v176_v21, %v175_v20  ;;  %v159_v24 = vld [vmem:[%s1224_s1 + $0x30] sm:$0xff] (!%p117_p9)  ;;  %v160_v25 = vld [vmem:[%s1224_s1 + $0x38] sm:$0xff] (!%p117_p9)  ;;  %v177_v26 = vld [vmem:[%s1224_s1 + $0xc0] sm:$0xff] (!%p117_p9) }
  0x13   : > { %v178_v27 = vld [vmem:[%s1224_s1 + $0xc8] sm:$0xff] (!%p117_p9)  ;;  %v700_v28 = vpack.c.bf16 (!%p117_p9), %v160_v25, %v159_v24  ;;  %v161_v30 = vld [vmem:[%s1224_s1 + $0x40] sm:$0xff] (!%p117_p9)  ;;  %v179_v32 = vld [vmem:[%s1224_s1 + $0xd0] sm:$0xff] (!%p117_p9) }
  0x14   : > { %v703_v29 = vpack.c.bf16 (!%p117_p9), %v178_v27, %v177_v26  ;;  %v162_v31 = vld [vmem:[%s1224_s1 + $0x48] sm:$0xff] (!%p117_p9)  ;;  %v180_v33 = vld [vmem:[%s1224_s1 + $0xd8] sm:$0xff] (!%p117_p9)  ;;  %v163_v36 = vld [vmem:[%s1224_s1 + $0x50] sm:$0xff] (!%p117_p9) }
  0x15   : > { %s1235_s27 = smov (!%p139_p10, %s581_s27), 31  ;;  %v706_v34 = vpack.c.bf16 %v162_v31, %v161_v30  ;;  %v709_v35 = vpack.c.bf16 %v180_v33, %v179_v32  ;;  %v164_v37 = vld [vmem:[%s1224_s1 + $0x58] sm:$0xff]  ;;  %v181_v38 = vld [vmem:[%s1224_s1 + $0xe0] sm:$0xff]  ;;  %v182_v39 = vld [vmem:[%s1224_s1 + $0xe8] sm:$0xff] }
  0x16   : > { %s582_s16 = sshll.u32 %s1235_s27, 3  ;;  %v712_v40 = vpack.c.bf16 %v164_v37, %v163_v36  ;;  %v715_v41 = vpack.c.bf16 %v182_v39, %v181_v38  ;;  %v165_v42 = vld [vmem:[%s1224_s1 + $0x60] sm:$0xff]  ;;  %v166_v43 = vld [vmem:[%s1224_s1 + $0x68] sm:$0xff]  ;;  %v183_v44 = vld [vmem:[%s1224_s1 + $0xf0] sm:$0xff]  ;;  %s822_s27 = scalar_lea.vmem %s821_s25, 4096 }
  0x17   : > { %s998_s26 = scalar_lea.vmem %s1223_s0, %s582_s16  ;;  %v184_v45 = vld [vmem:[%s1224_s1 + $0xf8] sm:$0xff]  ;;  %v718_v46 = vpack.c.bf16 %v166_v43, %v165_v42  ;;  %v167_v48 = vld [vmem:[%s1224_s1 + $0x70] sm:$0xff] }
  0x18   : > { %v1001_v16 = vld [vmem:[%s998_s26] sm:$0xff]  ;;  %v721_v47 = vpack.c.bf16 %v184_v45, %v183_v44  ;;  %v168_v49 = vld [vmem:[%s1224_s1 + $0x78] sm:$0xff]  ;;  %v146_v51 = vld [vmem:[%s998_s26 + $0x8] sm:$0xff] }
  0x19   : > { %v1004_v17 = vld [vmem:[%s998_s26 + $0x20] sm:$0xff]  ;;  %690 = vmatpush3.bf16.xpose.msk.msra.mxu0 %vm958_vm1, %v688_v14  ;;  %736 = vmatpush3.bf16.xpose.msk.msra.mxu1 %vm958_vm1, %v688_v14  ;;  %v724_v50 = vpack.c.bf16 %v168_v49, %v167_v48  ;;  %v150_v52 = vld [vmem:[%s998_s26 + $0x28] sm:$0xff]  ;;  %v147_v53 = vld [vmem:[%s998_s26 + $0x10] sm:$0xff] }
  0x1a   : > { %693 = vmatprep.subr.msk.bf16.mxu0 %vm958_vm1, %v691_v15  ;;  %729 = vmatprep.subr.msk.bf16.mxu1 %vm958_vm1, %v691_v15  ;;  %v151_v54 = vld [vmem:[%s998_s26 + $0x30] sm:$0xff]  ;;  %v148_v55 = vld [vmem:[%s998_s26 + $0x18] sm:$0xff] }
  0x1b   : > { %663 = vmatprep.mubr.msk.f32.mxu0 %vm185_vm0, %v1001_v16  ;;  %671 = vmatprep.mubr.msk.f32.mxu1 %vm185_vm0, %v1004_v17  ;;  %v152_v56 = vld [vmem:[%s998_s26 + $0x38] sm:$0xff]  ;;  %s135_s26 = sand.u32 1, %s870_s10  }
  0x1c   : > { %s580_s7 = sshll.u32 %s135_s26, 7  ;;  %s1182_s13 = scalar_lea.sflag [#allocation3], %s135_s26 }
  0x1d   : > { %s1153_s8 = scalar_lea.vmem [#allocation2], %s580_s7 }
  0x1e   : > { %s514_s16 = sshll.u32 %s1153_s8, 4  ;;  %s1175_s16 = int_to_ptr.vmem [resolvable:$true] %s514_s16 }
  0x1f   : > { %s816_s23 = scalar_lea.vmem %s1175_s16, 2048  ;;  %p823_p0 = scmp.lt.s32.totalorder %s1175_s16, %s821_s25 }
  0x20   : > { %p817_p11 = scmp.ne.s32.totalorder %s1175_s16, %s816_s23  ;;  %p824_p1 = scmp.lt.s32.totalorder %s822_s27, %s816_s23 }
  0x21   : > { %696 = vmatpush3.bf16.xpose.msk.msra.mxu0 %vm958_vm1, %v694_v22  ;;  %737 = vmatpush3.bf16.xpose.msk.msra.mxu1 %vm958_vm1, %v694_v22 }
  0x22   : > { %699 = vmatprep.subr.msk.bf16.mxu0 %vm958_vm1, %v697_v23  ;;  %730 = vmatprep.subr.msk.bf16.mxu1 %vm958_vm1, %v697_v23  ;;  %p818_p12 = pnand %p817_p11, %p936_p5  ;;  %p825_p2 = por %p824_p1, %p823_p0 }
  0x24   : > { %p819_p13 = pneg %p818_p12 }
  0x26   : > { %p826_p3 = pnand %p825_p2, %p819_p13 }
  0x29   : > { %702 = vmatpush3.bf16.xpose.msk.msra.mxu0 %vm958_vm1, %v700_v28  ;;  %738 = vmatpush3.bf16.xpose.msk.msra.mxu1 %vm958_vm1, %v700_v28 }
  0x2a   : > { %705 = vmatprep.subr.msk.bf16.mxu0 %vm958_vm1, %v703_v29  ;;  %731 = vmatprep.subr.msk.bf16.mxu1 %vm958_vm1, %v703_v29 }
  0x31   : > { %708 = vmatpush3.bf16.xpose.msk.msra.mxu0 %vm958_vm1, %v706_v34  ;;  %739 = vmatpush3.bf16.xpose.msk.msra.mxu1 %vm958_vm1, %v706_v34 }
  0x32   : > { %711 = vmatprep.subr.msk.bf16.mxu0 %vm958_vm1, %v709_v35  ;;  %732 = vmatprep.subr.msk.bf16.mxu1 %vm958_vm1, %v709_v35 }
  0x39   : > { %714 = vmatpush3.bf16.xpose.msk.msra.mxu0 %vm958_vm1, %v712_v40  ;;  %740 = vmatpush3.bf16.xpose.msk.msra.mxu1 %vm958_vm1, %v712_v40 }
  0x3a   : > { %717 = vmatprep.subr.msk.bf16.mxu0 %vm958_vm1, %v715_v41  ;;  %733 = vmatprep.subr.msk.bf16.mxu1 %vm958_vm1, %v715_v41 }
  0x41   : > { %720 = vmatpush3.bf16.xpose.msk.msra.mxu0 %vm958_vm1, %v718_v46  ;;  %741 = vmatpush3.bf16.xpose.msk.msra.mxu1 %vm958_vm1, %v718_v46 }
  0x42   : > { %723 = vmatprep.subr.msk.bf16.mxu0 %vm958_vm1, %v721_v47  ;;  %734 = vmatprep.subr.msk.bf16.mxu1 %vm958_vm1, %v721_v47 }
  0x49   : > { %726 = vmatpush3.bf16.xpose.msk.msra.mxu0 %vm958_vm1, %v724_v50  ;;  %742 = vmatpush3.bf16.xpose.msk.msra.mxu1 %vm958_vm1, %v724_v50 }
  0x50   : > { %664 = vmatmul.mubr.msk.f32.vlgmr.msra.gmra.mrb[0].mxu0 %vm185_vm0, %v1001_v16  ;;  %672 = vmatmul.mubr.msk.f32.vlgmr.msra.gmra.mrb[0].mxu1 %vm185_vm0, %v1004_v17 }
  0x51   : > { %665 = vmatprep.mubr.msk.f32.mxu0 %vm185_vm0, %v146_v51  ;;  %673 = vmatprep.mubr.msk.f32.mxu1 %vm185_vm0, %v150_v52 }
  0x54   : > { %666 = vmatmul.mubr.msk.f32.gmra.mrb[2].mxu0 %vm185_vm0, %v146_v51  ;;  %674 = vmatmul.mubr.msk.f32.gmra.mrb[2].mxu1 %vm185_vm0, %v150_v52 }
  0x55   : > { %667 = vmatprep.mubr.msk.f32.mxu0 %vm185_vm0, %v147_v53  ;;  %675 = vmatprep.mubr.msk.f32.mxu1 %vm185_vm0, %v151_v54 }
  0x58   : > { %668 = vmatmul.mubr.msk.f32.gmra.mrb[4].mxu0 %vm185_vm0, %v147_v53  ;;  %676 = vmatmul.mubr.msk.f32.gmra.mrb[4].mxu1 %vm185_vm0, %v151_v54 }
  0x59   : > { %669 = vmatprep.mubr.msk.f32.mxu0 %vm185_vm0, %v148_v55  ;;  %677 = vmatprep.mubr.msk.f32.mxu1 %vm185_vm0, %v152_v56 }
  0x5c   : > { %670 = vmatmul.mubr.msk.f32.gmra.mrb[6].mxu0 %vm185_vm0, %v148_v55  ;;  %678 = vmatmul.mubr.msk.f32.gmra.mrb[6].mxu1 %vm185_vm0, %v152_v56 }
 0x123   : > { %v372_v57 = vpop.f32.mrb[0].mxu0  ;;  %v396_v58 = vpop.f32.mrb[0].mxu1 }
 0x124   : > { %v419_v59 = vmul.f32 0.5, %v372_v57  ;;  %v427_v60 = vmul.f32 0.5, %v396_v58  ;;  %v374_v61 = vpop.f32.mrb[1].mxu0  ;;  %v398_v62 = vpop.f32.mrb[1].mxu1 }
 0x125   : > { %v420_v63 = vmul.f32 0.5, %v374_v61  ;;  %v428_v0 = vmul.f32 0.5, %v398_v62 }
 0x126   : > { %784 = vtanh.f32 %v419_v59 }
 0x127   : > { %786 = vtanh.f32 %v427_v60  ;;  %v378_v1 = vpop.f32.mrb[2].mxu0  ;;  %v402_v2 = vpop.f32.mrb[2].mxu1 }
 0x128   : > { %788 = vtanh.f32 %v420_v63  ;;  %v421_v3 = vmul.f32 0.5, %v378_v1  ;;  %v429_v4 = vmul.f32 0.5, %v402_v2  ;;  %v380_v5 = vpop.f32.mrb[3].mxu0  ;;  %v404_v6 = vpop.f32.mrb[3].mxu1 }
 0x129   : > { %790 = vtanh.f32 %v428_v0  ;;  %v422_v7 = vmul.f32 0.5, %v380_v5  ;;  %v430_v8 = vmul.f32 0.5, %v404_v6 }
 0x12a   : > { %792 = vtanh.f32 %v421_v3 }
 0x12b   : > { %794 = vtanh.f32 %v429_v4  ;;  %v384_v9 = vpop.f32.mrb[4].mxu0  ;;  %v408_v10 = vpop.f32.mrb[4].mxu1 }
 0x12c   : > { %796 = vtanh.f32 %v422_v7  ;;  %v423_v11 = vmul.f32 0.5, %v384_v9  ;;  %v431_v12 = vmul.f32 0.5, %v408_v10  ;;  %v386_v13 = vpop.f32.mrb[5].mxu0  ;;  %v410_v14 = vpop.f32.mrb[5].mxu1 }
 0x12d   : > { %798 = vtanh.f32 %v430_v8  ;;  %v424_v15 = vmul.f32 0.5, %v386_v13  ;;  %v432_v16 = vmul.f32 0.5, %v410_v14 }
 0x12e   : > { %800 = vtanh.f32 %v423_v11 }
 0x12f   : > { %802 = vtanh.f32 %v431_v12  ;;  %v390_v17 = vpop.f32.mrb[6].mxu0  ;;  %v414_v18 = vpop.f32.mrb[6].mxu1 }
 0x130   : > { %v785_v19 = vpop.eup %784  ;;  %804 = vtanh.f32 %v424_v15  ;;  %v425_v20 = vmul.f32 0.5, %v390_v17  ;;  %v433_v21 = vmul.f32 0.5, %v414_v18  ;;  %v392_v22 = vpop.f32.mrb[7].mxu0 }
 0x131   : > { %v416_v23 = vpop.f32.mrb[7].mxu1  ;;  %v787_v24 = vpop.eup %786  ;;  %v451_v25 = vmul.f32 0.5, %v785_v19  ;;  %806 = vtanh.f32 %v432_v16  ;;  %v426_v26 = vmul.f32 0.5, %v392_v22 }
 0x132   : > { %v434_v27 = vmul.f32 0.5, %v416_v23  ;;  %v789_v28 = vpop.eup %788  ;;  %v459_v29 = vmul.f32 0.5, %v787_v24  ;;  %808 = vtanh.f32 %v425_v20 }
 0x133   : > { %v791_v30 = vpop.eup %790  ;;  %v467_v31 = vadd.f32 0.5, %v451_v25  ;;  %v452_v32 = vmul.f32 0.5, %v789_v28  ;;  %810 = vtanh.f32 %v433_v21 }
 0x134   : > { %v793_v33 = vpop.eup %792  ;;  %v475_v34 = vadd.f32 0.5, %v459_v29  ;;  %v460_v35 = vmul.f32 0.5, %v791_v30  ;;  %812 = vtanh.f32 %v426_v26 }
 0x135   : > { %v795_v36 = vpop.eup %794  ;;  %483 = vst [vmem:[%s1153_s8] sm:$0xff] %v467_v31  ;;  %v468_v37 = vadd.f32 0.5, %v452_v32  ;;  %v453_v38 = vmul.f32 0.5, %v793_v33  ;;  %814 = vtanh.f32 %v434_v27 }
 0x136   : > { %v797_v39 = vpop.eup %796  ;;  %491 = vst [vmem:[%s1153_s8 + $0x40] sm:$0xff] %v475_v34  ;;  %v476_v40 = vadd.f32 0.5, %v460_v35  ;;  %v461_v41 = vmul.f32 0.5, %v795_v36 }
 0x137   : > { %v799_v42 = vpop.eup %798  ;;  %484 = vst [vmem:[%s1153_s8 + $0x8] sm:$0xff] %v468_v37  ;;  %v469_v43 = vadd.f32 0.5, %v453_v38  ;;  %v454_v44 = vmul.f32 0.5, %v797_v39 }
 0x138   : > { %v801_v45 = vpop.eup %800  ;;  %492 = vst [vmem:[%s1153_s8 + $0x48] sm:$0xff] %v476_v40  ;;  %v477_v46 = vadd.f32 0.5, %v461_v41  ;;  %v462_v47 = vmul.f32 0.5, %v799_v42 }
 0x139   : > { %v803_v48 = vpop.eup %802  ;;  %485 = vst [vmem:[%s1153_s8 + $0x10] sm:$0xff] %v469_v43  ;;  %v470_v49 = vadd.f32 0.5, %v454_v44  ;;  %v455_v50 = vmul.f32 0.5, %v801_v45 }
 0x13a   : > { %v805_v51 = vpop.eup %804  ;;  %493 = vst [vmem:[%s1153_s8 + $0x50] sm:$0xff] %v477_v46  ;;  %v478_v52 = vadd.f32 0.5, %v462_v47  ;;  %v463_v53 = vmul.f32 0.5, %v803_v48 }
 0x13b   : > { %v807_v54 = vpop.eup %806  ;;  %486 = vst [vmem:[%s1153_s8 + $0x18] sm:$0xff] %v470_v49  ;;  %v471_v55 = vadd.f32 0.5, %v455_v50  ;;  %v456_v56 = vmul.f32 0.5, %v805_v51 }
 0x13c   : > { %v809_v57 = vpop.eup %808  ;;  %494 = vst [vmem:[%s1153_s8 + $0x58] sm:$0xff] %v478_v52  ;;  %v479_v58 = vadd.f32 0.5, %v463_v53  ;;  %v464_v59 = vmul.f32 0.5, %v807_v54 }
 0x13d   : > { %v811_v60 = vpop.eup %810  ;;  %487 = vst [vmem:[%s1153_s8 + $0x20] sm:$0xff] %v471_v55  ;;  %v472_v61 = vadd.f32 0.5, %v456_v56  ;;  %v457_v62 = vmul.f32 0.5, %v809_v57 }
 0x13e   : > { %v813_v63 = vpop.eup %812  ;;  %495 = vst [vmem:[%s1153_s8 + $0x60] sm:$0xff] %v479_v58  ;;  %v480_v0 = vadd.f32 0.5, %v464_v59  ;;  %v465_v1 = vmul.f32 0.5, %v811_v60 }
 0x13f   : > { %v815_v2 = vpop.eup %814  ;;  %488 = vst [vmem:[%s1153_s8 + $0x28] sm:$0xff] %v472_v61  ;;  %v473_v3 = vadd.f32 0.5, %v457_v62  ;;  %v458_v4 = vmul.f32 0.5, %v813_v63 }
 0x140   : > { %496 = vst [vmem:[%s1153_s8 + $0x68] sm:$0xff] %v480_v0  ;;  %v481_v5 = vadd.f32 0.5, %v465_v1  ;;  %v466_v6 = vmul.f32 0.5, %v815_v2 }
 0x141   : > { %489 = vst [vmem:[%s1153_s8 + $0x30] sm:$0xff] %v473_v3  ;;  %v474_v7 = vadd.f32 0.5, %v458_v4 }
 0x142   : > { %497 = vst [vmem:[%s1153_s8 + $0x70] sm:$0xff] %v481_v5  ;;  %v482_v8 = vadd.f32 0.5, %v466_v6 }
 0x143   : > { %490 = vst [vmem:[%s1153_s8 + $0x38] sm:$0xff] %v474_v7 }
 0x144   : > { %498 = vst [vmem:[%s1153_s8 + $0x78] sm:$0xff] %v482_v8 }
 0x145   : > { %829 = shalt.err (!%p826_p3)
}
 0x146   : > { %s830_s28 = scalar_lea.hbm %s1173_s22, 2048  ;;  %s834_s3 = scalar_lea.hbm %s1225_s2, 8192 }
 0x147   : > { %p831_p4 = scmp.ne.s32.totalorder %s1173_s22, %s830_s28  ;;  %p835_p9 = scmp.lt.u32.totalorder %s1173_s22, %s1225_s2 }
 0x148   : > { %p836_p10 = scmp.lt.u32.totalorder %s834_s3, %s830_s28  ;;  %p838_p12 = scmp.lt.u32.totalorder %s830_s28, %s1173_s22 }
 0x149   : > { %p832_p7 = pnand %p831_p4, %p936_p5 }
 0x14a   : > { %p837_p11 = por %p836_p10, %p835_p9 }
 0x14b   : > { %p833_p8 = pneg %p832_p7 }
 0x14c   : > { %p839_p13 = por %p838_p12, %p837_p11 }
 0x14e   : > { %p840_p0 = pnand %p839_p13, %p833_p8 }
 0x150   : > { %843 = shalt.err (!%p840_p0)
}
 0x151   : > { %s881_s6 = smov 256   ;;  %s882_s26 = smov 16  }
 0x152   : > { %743 = dma.vmem_to_hbm [thread:$0]  (%p936_p5), %s1175_s16, 2048, %s1173_s22, %s1182_s13, %s881_s6, %s881_s6, %s882_s26  }
 0x153 PF: > { %p749_p1 = scmp.ge.s32.totalorder %s878_s12, 2  ;;  %s529_s7 = sand.u32 1, %s866_s9  }
 0x154   : > { %s530_s8 = scalar_lea.sflag [#allocation3], %s529_s7 }
 0x155   : > { %p746_p2 = pnand %p749_p1, %p940_p6 }
 0x157   : > { %861 = dma.done.wait (!%p746_p2), %s530_s8, 2048  }
 0x158   : > { %863 = vsyncadd (!%p746_p2), %s530_s8, 4294965248  ;;  %p12_p3 = scmp.ge.s32.totalorder %s923_s15, 6   ;;  %s1230_s9 = smov %s870_s10 }
 0x159   : > { %s1231_s10 = smov %s874_s11  ;;  %s1232_s11 = smov %s934_s18 }
 0x15a   : > { %s1233_s12 = smov %s923_s15  ;;  %14 = sbr.rel (!%p12_p3) target bundleno = 3 (0x3), region = 63 }
 0x161   :  { %535 = vsyncpa [#allocation3], 1 }
 0x162   :  { %537 = vsyncpa [#allocation3 + $0x1], 1 }

</bundles_post_ra>
